<compile_context>
chip_gen: v7x
topology: tpu7x:2x2x1
jax: 0.10.0
libtpu: 0.0.40
codegen_flags: <defaults>
</compile_context>

<pallas_src>
import functools

import jax
import jax.numpy as jnp
from jax import lax
from jax.experimental import pallas as pl
from jax.experimental.pallas import tpu as pltpu


LANE = 128


def _round_up(n, m):
    return ((n + m - 1) // m) * m


def _pick_batch_tile(batch):
    for t in (512, 256, 128):
        if batch % t == 0:
            return t
    return batch  # small / odd batch: single tile (block == full array dims)


def _ddqn_kernel(x_ref, w1_ref, b1_ref, w2_ref, b2_ref, wh_ref, bh_ref,
                 o_ref, adv_acc, *, tile_b, n_tiles, inv_ba):
    i = pl.program_id(0)

    @pl.when(i == 0)
    def _init():
        adv_acc[...] = jnp.zeros_like(adv_acc)

    # fc1 + relu (bf16 operands, f32 MXU accumulation)
    x = x_ref[...]
    h1 = jnp.dot(x, w1_ref[...], preferred_element_type=jnp.float32) + b1_ref[...]
    h1 = jnp.maximum(h1, 0.0).astype(jnp.bfloat16)

    # fc2 + relu
    h2 = jnp.dot(h1, w2_ref[...], preferred_element_type=jnp.float32) + b2_ref[...]
    h2 = jnp.maximum(h2, 0.0).astype(jnp.bfloat16)

    # fused dueling head: lane 0 = value, lanes 1..A = advantages, rest = exact 0
    head = jnp.dot(h2, wh_ref[...], preferred_element_type=jnp.float32) + bh_ref[...]
    val = head[:, 0:1]                              # (tile_b, 1)

    # write raw (val + adv) for this tile into the batch-resident output slab;
    # the global advantage mean is subtracted once, at the last grid step.
    row0 = pl.multiple_of(i * tile_b, tile_b)
    o_ref[pl.ds(row0, tile_b), :] = head + val

    # per-lane column sums (lane 0 holds the value column, padded lanes stay 0)
    adv_acc[...] += jnp.sum(head, axis=0, keepdims=True)

    @pl.when(i == n_tiles - 1)
    def _finalize():
        lane = lax.broadcasted_iota(jnp.int32, adv_acc.shape, 1)
        adv_total = jnp.sum(jnp.where(lane >= 1, adv_acc[...], 0.0))
        adv_mean = adv_total * inv_ba               # compile-time 1/(B*A)

        def sub_tile(t, carry):
            r0 = pl.multiple_of(t * tile_b, tile_b)
            o_ref[pl.ds(r0, tile_b), :] = o_ref[pl.ds(r0, tile_b), :] - adv_mean
            return carry

        lax.fori_loop(0, n_tiles, sub_tile, 0)


def prepare_params(params, input_size, output_size, hidden_size):
    """Fuse the two heads, zero-pad all feature dims to 128 lanes, cast weights to bf16."""
    w1, b1, w2, b2, wadv, badv, wval, bval = params
    in_p = _round_up(input_size, LANE)
    h_p = _round_up(hidden_size, LANE)
    n_p = _round_up(output_size + 1, LANE)

    def pad2(a, r, c):
        return jnp.pad(a, ((0, r - a.shape[0]), (0, c - a.shape[1])))

    w1p = pad2(w1, in_p, h_p).astype(jnp.bfloat16)
    b1p = pad2(b1, 1, h_p).astype(jnp.float32)
    w2p = pad2(w2, h_p, h_p).astype(jnp.bfloat16)
    b2p = pad2(b2, 1, h_p).astype(jnp.float32)
    wh = jnp.concatenate([wval, wadv], axis=1)       # (hidden, 1 + A)
    bh = jnp.concatenate([bval, badv], axis=1)       # (1, 1 + A)
    whp = pad2(wh, h_p, n_p).astype(jnp.bfloat16)
    bhp = pad2(bh, 1, n_p).astype(jnp.float32)
    return (w1p, b1p, w2p, b2p, whp, bhp)


def ddqn_forward(x, prepped, output_size, *, tile_b=None):
    w1p, b1p, w2p, b2p, whp, bhp = prepped
    batch, in_dim = x.shape
    in_p = w1p.shape[0]
    n_p = whp.shape[1]
    a = output_size

    if tile_b is None:
        tile_b = _pick_batch_tile(batch)
    assert batch % tile_b == 0, "batch must be a multiple of the batch tile"
    n_tiles = batch // tile_b

    # lane-align + cast activations (zero feature padding is exact: 0 * w = 0)
    xp = jnp.pad(x, ((0, 0), (0, in_p - in_dim))).astype(jnp.bfloat16)

    kernel = functools.partial(_ddqn_kernel, tile_b=tile_b, n_tiles=n_tiles,
                               inv_ba=1.0 / float(batch * a))

    def resident(arr):
        return pl.BlockSpec(arr.shape, lambda i: (0, 0))

    out_padded = pl.pallas_call(
        kernel,
        out_shape=jax.ShapeDtypeStruct((batch, n_p), jnp.float32),
        grid=(n_tiles,),
        in_specs=[pl.BlockSpec((tile_b, in_p), lambda i: (i, 0)),  # pipelined x tiles
                  resident(w1p), resident(b1p),
                  resident(w2p), resident(b2p),
                  resident(whp), resident(bhp)],
        # output resident across the (reduction) batch axis so the global
        # adv-mean can be subtracted at the final step
        out_specs=pl.BlockSpec((batch, n_p), lambda i: (0, 0)),
        scratch_shapes=[pltpu.VMEM((1, n_p), jnp.float32)],
        compiler_params=pltpu.CompilerParams(
            dimension_semantics=("arbitrary",)),
    )(xp, w1p, b1p, w2p, b2p, whp, bhp)

    # drop the value column (lane 0) and the lane padding
    return out_padded[:, 1:1 + a]


def init_params(key, input_size, output_size, hidden_size):
    # Deterministic PyTorch-Linear-style init; weights stored (in, out) so y = x @ W + b.
    ks = jax.random.split(key, 8)

    def lin(kw, kb, fan_in, fan_out):
        bound = 1.0 / jnp.sqrt(jnp.float32(fan_in))
        w = jax.random.uniform(kw, (fan_in, fan_out), jnp.float32, -bound, bound)
        b = jax.random.uniform(kb, (1, fan_out), jnp.float32, -bound, bound)
        return w, b

    w1, b1 = lin(ks[0], ks[1], input_size, hidden_size)
    w2, b2 = lin(ks[2], ks[3], hidden_size, hidden_size)
    wadv, badv = lin(ks[4], ks[5], hidden_size, output_size)
    wval, bval = lin(ks[6], ks[7], hidden_size, 1)
    return (w1, b1, w2, b2, wadv, badv, wval, bval)


def ddqn_reference(x, params, *, use_bf16):
    """Plain-JAX reference. use_bf16=True mirrors the kernel's bf16/f32-accum math."""
    w1, b1, w2, b2, wadv, badv, wval, bval = params
    if use_bf16:
        cast = lambda t: t.astype(jnp.bfloat16)
        xb = cast(x)
        h1 = jnp.maximum(jnp.dot(xb, cast(w1), preferred_element_type=jnp.float32) + b1, 0.0)
        h1 = cast(h1)
        h2 = jnp.maximum(jnp.dot(h1, cast(w2), preferred_element_type=jnp.float32) + b2, 0.0)
        h2 = cast(h2)
        adv = jnp.dot(h2, cast(wadv), preferred_element_type=jnp.float32) + badv
        val = jnp.dot(h2, cast(wval), preferred_element_type=jnp.float32) + bval
    else:
        h1 = jnp.maximum(x @ w1 + b1, 0.0)
        h2 = jnp.maximum(h1 @ w2 + b2, 0.0)
        adv = h2 @ wadv + badv
        val = h2 @ wval + bval
    return val + adv - jnp.mean(adv)   # global scalar mean, exactly as in the PyTorch module


if __name__ == "__main__":
    INPUT_SIZE = 16
    OUTPUT_SIZE = 4
    HIDDEN = 128   # PyTorch module default; already MXU/lane aligned
    BATCH = 256    # two 128-row tiles -> exercises the pipelined batch grid

    key = jax.random.PRNGKey(0)
    kx, kp = jax.random.split(key)
    x = jax.random.normal(kx, (BATCH, INPUT_SIZE), jnp.float32)
    params = init_params(kp, INPUT_SIZE, OUTPUT_SIZE, HIDDEN)
    prepped = prepare_params(params, INPUT_SIZE, OUTPUT_SIZE, HIDDEN)

    out = ddqn_forward(x, prepped, OUTPUT_SIZE)
    out = jax.block_until_ready(out)

    ref_bf16 = ddqn_reference(x, params, use_bf16=True)   # same math as the kernel
    ref_f32 = ddqn_reference(x, params, use_bf16=False)   # full-precision sanity check

    assert out.shape == (BATCH, OUTPUT_SIZE)
    err_bf16 = float(jnp.max(jnp.abs(out - ref_bf16)))
    err_f32 = float(jnp.max(jnp.abs(out - ref_f32)))
    assert err_bf16 < 5e-3, f"mismatch vs bf16-mirrored reference: {err_bf16}"
    assert err_f32 < 1e-1, f"mismatch vs f32 reference: {err_f32}"

    print("KERNEL_OK")
</pallas_src>

<mosaic_0001>
module attributes {stable_mosaic.version = 11 : i64} {
  func.func @_ddqn_kernel(%arg0: i32, %arg1: memref<256x128xbf16, #tpu.memory_space<vmem>>, %arg2: memref<128x128xbf16, #tpu.memory_space<vmem>>, %arg3: memref<1x128xf32, #tpu.memory_space<vmem>>, %arg4: memref<128x128xbf16, #tpu.memory_space<vmem>>, %arg5: memref<1x128xf32, #tpu.memory_space<vmem>>, %arg6: memref<128x128xbf16, #tpu.memory_space<vmem>>, %arg7: memref<1x128xf32, #tpu.memory_space<vmem>>, %arg8: memref<256x128xf32, #tpu.memory_space<vmem>>, %arg9: memref<1x128xf32, #tpu.memory_space<vmem>>) attributes {dimension_semantics = [#tpu.dimension_semantics<arbitrary>], iteration_bounds = array<i64: 1>, scalar_prefetch = 0 : i64, scratch_operands = 1 : i64, tpu.core_type = #tpu.core_type<tc>, window_params = [{transform_indices = @transform_0, window_bounds = array<i64: 256, 128>}, {pipeline_mode = #tpu.pipeline_mode<synchronous>, transform_indices = @transform_1, window_bounds = array<i64: 128, 128>}, {pipeline_mode = #tpu.pipeline_mode<synchronous>, transform_indices = @transform_2, window_bounds = array<i64: 1, 128>}, {pipeline_mode = #tpu.pipeline_mode<synchronous>, transform_indices = @transform_3, window_bounds = array<i64: 128, 128>}, {pipeline_mode = #tpu.pipeline_mode<synchronous>, transform_indices = @transform_4, window_bounds = array<i64: 1, 128>}, {pipeline_mode = #tpu.pipeline_mode<synchronous>, transform_indices = @transform_5, window_bounds = array<i64: 128, 128>}, {pipeline_mode = #tpu.pipeline_mode<synchronous>, transform_indices = @transform_6, window_bounds = array<i64: 1, 128>}, {pipeline_mode = #tpu.pipeline_mode<synchronous>, transform_indices = @transform_7, window_bounds = array<i64: 256, 128>}]} {
    %c0_i32 = arith.constant 0 : i32
    %0 = arith.cmpi eq, %arg0, %c0_i32 : i32
    %1 = arith.extui %0 : i1 to i32
    %c0_i32_0 = arith.constant 0 : i32
    %2 = arith.cmpi ne, %1, %c0_i32_0 : i32
    scf.if %2 {
      %cst_26 = arith.constant 0.000000e+00 : f32
      %40 = vector.broadcast %cst_26 : f32 to vector<1x128xf32>
      %c0_27 = arith.constant 0 : index
      %c0_28 = arith.constant 0 : index
      %41 = vector.load %arg9[%c0_27, %c0_28] : memref<1x128xf32, #tpu.memory_space<vmem>>, vector<1x128xf32>
      tpu.vector_store %arg9[%c0_27, %c0_28], %40 {strides = array<i32>} : memref<1x128xf32, #tpu.memory_space<vmem>>, vector<1x128xf32>,
    } else {
    }
    %c0 = arith.constant 0 : index
    %c0_1 = arith.constant 0 : index
    %3 = vector.load %arg1[%c0, %c0_1] : memref<256x128xbf16, #tpu.memory_space<vmem>>, vector<256x128xbf16>
    %c0_2 = arith.constant 0 : index
    %c0_3 = arith.constant 0 : index
    %4 = vector.load %arg2[%c0_2, %c0_3] : memref<128x128xbf16, #tpu.memory_space<vmem>>, vector<128x128xbf16>
    %cst = arith.constant dense<0.000000e+00> : vector<256x128xf32>
    %5 = tpu.matmul %3, %4, %cst {dimension_numbers = #tpu.dot_dimension_numbers<[1], [0], [0], [1], [0, 0, 1, 1], [], []>} : vector<256x128xbf16>, vector<128x128xbf16>, vector<256x128xf32> -> vector<256x128xf32>
    %c0_4 = arith.constant 0 : index
    %c0_5 = arith.constant 0 : index
    %6 = vector.load %arg3[%c0_4, %c0_5] : memref<1x128xf32, #tpu.memory_space<vmem>>, vector<1x128xf32>
    %7 = vector.broadcast %6 : vector<1x128xf32> to vector<256x128xf32>
    %8 = arith.addf %5, %7 : vector<256x128xf32>
    %cst_6 = arith.constant 0.000000e+00 : f32
    %9 = vector.broadcast %cst_6 : f32 to vector<256x128xf32>
    %10 = arith.maximumf %8, %9 : vector<256x128xf32>
    %11 = arith.truncf %10 : vector<256x128xf32> to vector<256x128xbf16>
    %c0_7 = arith.constant 0 : index
    %c0_8 = arith.constant 0 : index
    %12 = vector.load %arg4[%c0_7, %c0_8] : memref<128x128xbf16, #tpu.memory_space<vmem>>, vector<128x128xbf16>
    %cst_9 = arith.constant dense<0.000000e+00> : vector<256x128xf32>
    %13 = tpu.matmul %11, %12, %cst_9 {dimension_numbers = #tpu.dot_dimension_numbers<[1], [0], [0], [1], [0, 0, 1, 1], [], []>} : vector<256x128xbf16>, vector<128x128xbf16>, vector<256x128xf32> -> vector<256x128xf32>
    %c0_10 = arith.constant 0 : index
    %c0_11 = arith.constant 0 : index
    %14 = vector.load %arg5[%c0_10, %c0_11] : memref<1x128xf32, #tpu.memory_space<vmem>>, vector<1x128xf32>
    %15 = vector.broadcast %14 : vector<1x128xf32> to vector<256x128xf32>
    %16 = arith.addf %13, %15 : vector<256x128xf32>
    %cst_12 = arith.constant 0.000000e+00 : f32
    %17 = vector.broadcast %cst_12 : f32 to vector<256x128xf32>
    %18 = arith.maximumf %16, %17 : vector<256x128xf32>
    %19 = arith.truncf %18 : vector<256x128xf32> to vector<256x128xbf16>
    %c0_13 = arith.constant 0 : index
    %c0_14 = arith.constant 0 : index
    %20 = vector.load %arg6[%c0_13, %c0_14] : memref<128x128xbf16, #tpu.memory_space<vmem>>, vector<128x128xbf16>
    %cst_15 = arith.constant dense<0.000000e+00> : vector<256x128xf32>
    %21 = tpu.matmul %19, %20, %cst_15 {dimension_numbers = #tpu.dot_dimension_numbers<[1], [0], [0], [1], [0, 0, 1, 1], [], []>} : vector<256x128xbf16>, vector<128x128xbf16>, vector<256x128xf32> -> vector<256x128xf32>
    %c0_16 = arith.constant 0 : index
    %c0_17 = arith.constant 0 : index
    %22 = vector.load %arg7[%c0_16, %c0_17] : memref<1x128xf32, #tpu.memory_space<vmem>>, vector<1x128xf32>
    %23 = vector.broadcast %22 : vector<1x128xf32> to vector<256x128xf32>
    %24 = arith.addf %21, %23 : vector<256x128xf32>
    %25 = vector.extract_strided_slice %24 {offsets = [0, 0], sizes = [256, 1], strides = [1, 1]} : vector<256x128xf32> to vector<256x1xf32>
    %c256_i32 = arith.constant 256 : i32
    %26 = arith.muli %arg0, %c256_i32 : i32
    %27 = tpu.assume_multiple %26, 256 : i32
    %28 = vector.broadcast %25 : vector<256x1xf32> to vector<256x128xf32>
    %29 = arith.addf %24, %28 : vector<256x128xf32>
    %30 = arith.index_cast %27 : i32 to index
    %c0_18 = arith.constant 0 : index
    %31 = vector.load %arg8[%30, %c0_18] : memref<256x128xf32, #tpu.memory_space<vmem>>, vector<256x128xf32>
    tpu.vector_store %arg8[%30, %c0_18], %29 {strides = array<i32>} : memref<256x128xf32, #tpu.memory_space<vmem>>, vector<256x128xf32>,
    %c0_19 = arith.constant 0 : index
    %c0_20 = arith.constant 0 : index
    %32 = vector.load %arg9[%c0_19, %c0_20] : memref<1x128xf32, #tpu.memory_space<vmem>>, vector<1x128xf32>
    %cst_21 = arith.constant dense<0.000000e+00> : vector<128xf32>
    %33 = vector.multi_reduction <add>, %24, %cst_21 [0] : vector<256x128xf32> to vector<128xf32>
    %34 = vector.shape_cast %33 : vector<128xf32> to vector<1x128xf32>
    %35 = arith.addf %32, %34 : vector<1x128xf32>
    %c0_22 = arith.constant 0 : index
    %c0_23 = arith.constant 0 : index
    %36 = vector.load %arg9[%c0_22, %c0_23] : memref<1x128xf32, #tpu.memory_space<vmem>>, vector<1x128xf32>
    tpu.vector_store %arg9[%c0_22, %c0_23], %35 {strides = array<i32>} : memref<1x128xf32, #tpu.memory_space<vmem>>, vector<1x128xf32>,
    %c0_i32_24 = arith.constant 0 : i32
    %37 = arith.cmpi eq, %arg0, %c0_i32_24 : i32
    %38 = arith.extui %37 : i1 to i32
    %c0_i32_25 = arith.constant 0 : i32
    %39 = arith.cmpi ne, %38, %c0_i32_25 : i32
    scf.if %39 {
      %40 = tpu.iota {dimensions = array<i32: 1>} : vector<1x128xi32>
      %c1_i32 = arith.constant 1 : i32
      %41 = vector.broadcast %c1_i32 : i32 to vector<1x128xi32>
      %42 = arith.cmpi sge, %40, %41 : vector<1x128xi32>
      %c0_26 = arith.constant 0 : index
      %c0_27 = arith.constant 0 : index
      %43 = vector.load %arg9[%c0_26, %c0_27] : memref<1x128xf32, #tpu.memory_space<vmem>>, vector<1x128xf32>
      %cst_28 = arith.constant 0.000000e+00 : f32
      %44 = vector.broadcast %cst_28 : f32 to vector<1x128xf32>
      %45 = arith.select %42, %43, %44 : vector<1x128xi1>, vector<1x128xf32>
      %46 = vector.shape_cast %45 : vector<1x128xf32> to vector<1x1x128xf32>
      %cst_29 = arith.constant dense<0.000000e+00> : vector<1xf32>
      %47 = vector.multi_reduction <add>, %46, %cst_29 [1, 2] : vector<1x1x128xf32> to vector<1xf32>
      %48 = vector.shape_cast %47 : vector<1xf32> to vector<1x1x1xf32>
      %49 = vector.extract %48[0, 0, 0] : f32 from vector<1x1x1xf32>
      %cst_30 = arith.constant 9.765625E-4 : f32
      %50 = arith.mulf %49, %cst_30 : f32
      %c0_i32_31 = arith.constant 0 : i32
      %c256_i32_32 = arith.constant 256 : i32
      %51 = arith.muli %c0_i32_31, %c256_i32_32 : i32
      %52 = tpu.assume_multiple %51, 256 : i32
      %53 = arith.index_cast %52 : i32 to index
      %c0_33 = arith.constant 0 : index
      %54 = vector.load %arg8[%53, %c0_33] : memref<256x128xf32, #tpu.memory_space<vmem>>, vector<256x128xf32>
      %55 = vector.broadcast %50 : f32 to vector<256x128xf32>
      %56 = arith.subf %54, %55 : vector<256x128xf32>
      %57 = arith.index_cast %52 : i32 to index
      %c0_34 = arith.constant 0 : index
      %58 = vector.load %arg8[%57, %c0_34] : memref<256x128xf32, #tpu.memory_space<vmem>>, vector<256x128xf32>
      tpu.vector_store %arg8[%57, %c0_34], %56 {strides = array<i32>} : memref<256x128xf32, #tpu.memory_space<vmem>>, vector<256x128xf32>,
      %c1_i32_35 = arith.constant 1 : i32
    } else {
    }
    return
  }
  func.func @transform_0(%arg0: i32) -> (i32, i32) {
    %c0_i32 = arith.constant 0 : i32
    %c0_i32_0 = arith.constant 0 : i32
    return %arg0, %c0_i32 : i32, i32
  }
  func.func @transform_1(%arg0: i32) -> (i32, i32) {
    %c0_i32 = arith.constant 0 : i32
    %c0_i32_0 = arith.constant 0 : i32
    %c0_i32_1 = arith.constant 0 : i32
    return %c0_i32, %c0_i32_0 : i32, i32
  }
  func.func @transform_2(%arg0: i32) -> (i32, i32) {
    %c0_i32 = arith.constant 0 : i32
    %c0_i32_0 = arith.constant 0 : i32
    %c0_i32_1 = arith.constant 0 : i32
    return %c0_i32, %c0_i32_0 : i32, i32
  }
  func.func @transform_3(%arg0: i32) -> (i32, i32) {
    %c0_i32 = arith.constant 0 : i32
    %c0_i32_0 = arith.constant 0 : i32
    %c0_i32_1 = arith.constant 0 : i32
    return %c0_i32, %c0_i32_0 : i32, i32
  }
  func.func @transform_4(%arg0: i32) -> (i32, i32) {
    %c0_i32 = arith.constant 0 : i32
    %c0_i32_0 = arith.constant 0 : i32
    %c0_i32_1 = arith.constant 0 : i32
    return %c0_i32, %c0_i32_0 : i32, i32
  }
  func.func @transform_5(%arg0: i32) -> (i32, i32) {
    %c0_i32 = arith.constant 0 : i32
    %c0_i32_0 = arith.constant 0 : i32
    %c0_i32_1 = arith.constant 0 : i32
    return %c0_i32, %c0_i32_0 : i32, i32
  }
  func.func @transform_6(%arg0: i32) -> (i32, i32) {
    %c0_i32 = arith.constant 0 : i32
    %c0_i32_0 = arith.constant 0 : i32
    %c0_i32_1 = arith.constant 0 : i32
    return %c0_i32, %c0_i32_0 : i32, i32
  }
  func.func @transform_7(%arg0: i32) -> (i32, i32) {
    %c0_i32 = arith.constant 0 : i32
    %c0_i32_0 = arith.constant 0 : i32
    %c0_i32_1 = arith.constant 0 : i32
    return %c0_i32, %c0_i32_0 : i32, i32
  }
}

</mosaic_0001>

<bundles_post_ra>
// kernel: tpu_custom_call.1
= control target key start
LH: loop header
LB: loop body
LE: loop exit
PB: predicated region body
PF: predicated region fallthrough
CT: control target
= control target key end

     0   :  { %12 = vsyncpa [#allocation4], 0  ;;  %s2367_s0 = inlined_call_operand.hbm [shape: bf16[256,128], index: 0, kind: input, shape index: {}]   ;;  %s2368_s1 = inlined_call_operand.hbm [shape: bf16[128,128], index: 1, kind: input, shape index: {}]   ;;  %s2369_s2 = inlined_call_operand.vmem [shape: f32[1,128], index: 2, kind: input, shape index: {}]   ;;  %s2370_s3 = inlined_call_operand.hbm [shape: bf16[128,128], index: 3, kind: input, shape index: {}]   ;;  %s2371_s4 = inlined_call_operand.vmem [shape: f32[1,128], index: 4, kind: input, shape index: {}]   ;;  %s2372_s5 = inlined_call_operand.hbm [shape: bf16[128,128], index: 5, kind: input, shape index: {}]   ;;  %s2373_s6 = inlined_call_operand.vmem [shape: f32[1,128], index: 6, kind: input, shape index: {}]   ;;  %s2374_s7 = inlined_call_operand.hbm [shape: f32[256,128], index: 7, kind: output, shape index: {}]  }
   0x1   :  { %13 = vsyncpa [#allocation7], 0 }
   0x2   :  { %14 = vsyncpa [#allocation10], 0 }
   0x3   :  { %15 = vsyncpa [#allocation5], 0  ;;  %s1858_s24 = smov [#allocation6]   ;;  %s1859_s26 = smov [#allocation3]  }
   0x4   :  { %s33_s25 = sshll.u32 %s1858_s24, 4  ;;  %s21_s27 = sshll.u32 %s1859_s26, 4  ;;  %s34_s25 = int_to_ptr.vmem [resolvable:$true] %s33_s25  ;;  %s1909_s27 = int_to_ptr.vmem [resolvable:$true] %s21_s27 }
   0x5   :  { %s1740_s30 = scalar_lea.hbm %s2368_s1, 1024 }
   0x6   :  { %p1741_p0 = scmp.ne.s32.totalorder %s2368_s1, %s1740_s30  ;;  %p1744_p1 = scmp.lt.u32.totalorder %s1740_s30, %s2368_s1 }
   0x8   :  { %p1746_p2 = pnand %p1744_p1, %p1741_p0 }
   0xa   :  { %1749 = shalt.err (!%p1746_p2)
}
   0xb   :  { %s1750_s12 = scalar_lea.vmem %s34_s25, 1024  ;;  %p1755_p4 = scmp.lt.s32.totalorder %s34_s25, %s34_s25 }
   0xc   :  { %p1751_p3 = scmp.ne.s32.totalorder %s34_s25, %s1750_s12  ;;  %p1756_p5 = scmp.lt.s32.totalorder %s1750_s12, %s1750_s12 }
   0xe   :  { %p1757_p6 = por %p1756_p5, %p1755_p4 }
  0x10   :  { %p1758_p7 = pnand %p1757_p6, %p1751_p3 }
  0x12   :  { %1761 = shalt.err (!%p1758_p7)
}
  0x13   :  { %s1860_s13 = smov 64   ;;  %s1861_s14 = smov 4  }
  0x14   :  { %39 = dma.hbm_to_vmem [thread:$0]  %s2368_s1, 1024, %s34_s25, [#allocation7], %s1860_s13, %s1860_s13, %s1861_s14  }
  0x15   :  { %s1762_s19 = scalar_lea.hbm %s2367_s0, 2048 }
  0x16   :  { %p1763_p8 = scmp.ne.s32.totalorder %s2367_s0, %s1762_s19  ;;  %p1766_p9 = scmp.lt.u32.totalorder %s1762_s19, %s2367_s0 }
  0x18   :  { %p1768_p10 = pnand %p1766_p9, %p1763_p8 }
  0x1a   :  { %1771 = shalt.err (!%p1768_p10)
}
  0x1b   :  { %s1772_s24 = scalar_lea.vmem %s1909_s27, 2048  ;;  %p1777_p12 = scmp.lt.s32.totalorder %s1909_s27, %s1909_s27 }
  0x1c   :  { %p1773_p11 = scmp.ne.s32.totalorder %s1909_s27, %s1772_s24  ;;  %p1778_p13 = scmp.lt.s32.totalorder %s1772_s24, %s1772_s24 }
  0x1e   :  { %p1779_p0 = por %p1778_p13, %p1777_p12 }
  0x20   :  { %p1780_p1 = pnand %p1779_p0, %p1773_p11 }
  0x22   :  { %1783 = shalt.err (!%p1780_p1)
}
  0x23   :  { %27 = dma.hbm_to_vmem [thread:$0]  %s2367_s0, 2048, %s1909_s27, [#allocation4], %s1860_s13, %s1860_s13, %s1861_s14  }
  0x24   :  { %s1862_s26 = smov [#allocation8]   ;;  %s1863_s29 = smov [#allocation9]  }
  0x25   :  { %s47_s28 = sshll.u32 %s1862_s26, 4  ;;  %s61_s30 = sshll.u32 %s1863_s29, 4  ;;  %s48_s28 = int_to_ptr.vmem [resolvable:$true] %s47_s28  ;;  %s1946_s30 = int_to_ptr.vmem [resolvable:$true] %s61_s30 }
  0x26   :  { %s1784_s10 = scalar_lea.hbm %s2370_s3, 1024 }
  0x27   :  { %p1785_p2 = scmp.ne.s32.totalorder %s2370_s3, %s1784_s10  ;;  %p1788_p3 = scmp.lt.u32.totalorder %s1784_s10, %s2370_s3 }
  0x29   :  { %p1790_p4 = pnand %p1788_p3, %p1785_p2 }
  0x2b   :  { %1793 = shalt.err (!%p1790_p4)
}
  0x2c   :  { %s1794_s0 = scalar_lea.vmem %s48_s28, 1024  ;;  %p1799_p6 = scmp.lt.s32.totalorder %s48_s28, %s48_s28 }
  0x2d   :  { %p1795_p5 = scmp.ne.s32.totalorder %s48_s28, %s1794_s0  ;;  %p1800_p7 = scmp.lt.s32.totalorder %s1794_s0, %s1794_s0 }
  0x2f   :  { %p1801_p8 = por %p1800_p7, %p1799_p6 }
  0x31   :  { %p1802_p9 = pnand %p1801_p8, %p1795_p5 }
  0x33   :  { %1805 = shalt.err (!%p1802_p9)
}
  0x34   :  { %53 = dma.hbm_to_vmem [thread:$0]  %s2370_s3, 1024, %s48_s28, [#allocation7], %s1860_s13, %s1860_s13, %s1861_s14  }
  0x35   :  { %s1806_s20 = scalar_lea.hbm %s2372_s5, 1024 }
  0x36   :  { %p1807_p10 = scmp.ne.s32.totalorder %s2372_s5, %s1806_s20  ;;  %p1810_p11 = scmp.lt.u32.totalorder %s1806_s20, %s2372_s5 }
  0x38   :  { %p1812_p12 = pnand %p1810_p11, %p1807_p10 }
  0x3a   :  { %1815 = shalt.err (!%p1812_p12)
}
  0x3b   :  { %s1816_s1 = scalar_lea.vmem %s1946_s30, 1024  ;;  %p1821_p0 = scmp.lt.s32.totalorder %s1946_s30, %s1946_s30 }
  0x3c   :  { %p1817_p13 = scmp.ne.s32.totalorder %s1946_s30, %s1816_s1  ;;  %p1822_p1 = scmp.lt.s32.totalorder %s1816_s1, %s1816_s1 }
  0x3e   :  { %p1823_p2 = por %p1822_p1, %p1821_p0 }
  0x40   :  { %p1824_p3 = pnand %p1823_p2, %p1817_p13 }
  0x42   :  { %1827 = shalt.err (!%p1824_p3)
}
  0x43   :  { %67 = dma.hbm_to_vmem [thread:$0]  %s2372_s5, 1024, %s1946_s30, [#allocation10], %s1860_s13, %s1860_s13, %s1861_s14  }
  0x44   :  { %1850 = dma.done.wait [#allocation4], 2048  }
  0x45   :  { %1851 = vsyncadd [#allocation4], 4294965248 }
  0x46   :  { %1852 = dma.done.wait [#allocation7], 2048  }
  0x47   :  { %1853 = vsyncadd [#allocation7], 4294965248 }
  0x48   :  { %1854 = dma.done.wait [#allocation10], 1024  }
  0x49   :  { %1855 = vsyncadd [#allocation10], 4294966272  ;;  %v1700_v0 = vld [vmem:[#allocation6] sm:$0xff]   ;;  %v1701_v1 = vld [vmem:[#allocation6 + $0x8] sm:$0xff]   ;;  %vm1282_vm1 = vcmask 1040384   ;;  %s1866_s29 = smov [#allocation11]  }
  0x4a   :  { %1525 = vmatprep.subr.bf16.mxu0 %v1700_v0  ;;  %1669 = vmatprep.subr.bf16.mxu1 %v1700_v0  ;;  %v1702_v2 = vld [vmem:[#allocation6 + $0x10] sm:$0xff]   ;;  %v1703_v3 = vld [vmem:[#allocation6 + $0x18] sm:$0xff]   ;;  %v1708_v4 = vld [vmem:[#allocation3] sm:$0xff]   ;;  %s1396_s30 = sshll.u32 %s1866_s29, 4  ;;  %s2340_s30 = int_to_ptr.vmem [resolvable:$true] %s1396_s30 }
  0x4b   :  { %1526 = vmatpush3.bf16.msra.mxu0 %v1700_v0  ;;  %1677 = vmatpush3.bf16.msra.mxu1 %v1700_v0  ;;  %v1704_v5 = vld [vmem:[#allocation6 + $0x20] sm:$0xff]   ;;  %v1705_v6 = vld [vmem:[#allocation6 + $0x28] sm:$0xff]   ;;  %v1706_v8 = vld [vmem:[#allocation6 + $0x30] sm:$0xff]   ;;  %s1828_s8 = scalar_lea.vmem %s2340_s30, 4096  ;;  %p1833_p5 = scmp.lt.s32.totalorder %s2340_s30, %s2340_s30 }
  0x4c   :  { %1527 = vmatprep.subr.bf16.mxu0 %v1701_v1  ;;  %1670 = vmatprep.subr.bf16.mxu1 %v1701_v1  ;;  %v1716_v7 = vld [vmem:[#allocation3 + $0x40] sm:$0xff]   ;;  %v1707_v9 = vld [vmem:[#allocation6 + $0x38] sm:$0xff]   ;;  %v1709_v10 = vld [vmem:[#allocation3 + $0x8] sm:$0xff]   ;;  %p1829_p4 = scmp.ne.s32.totalorder %s2340_s30, %s1828_s8  ;;  %p1834_p6 = scmp.lt.s32.totalorder %s1828_s8, %s1828_s8 }
  0x4d   :  { %1541 = vmatprep.mubr.bf16.mxu0 %v1708_v4  ;;  %1557 = vmatprep.mubr.bf16.mxu1 %v1716_v7  ;;  %v1717_v11 = vld [vmem:[#allocation3 + $0x48] sm:$0xff]   ;;  %v1724_v12 = vld [vmem:[#allocation8] sm:$0xff]   ;;  %v1710_v13 = vld [vmem:[#allocation3 + $0x10] sm:$0xff]  }
  0x4e   :  { %v1718_v14 = vld [vmem:[#allocation3 + $0x50] sm:$0xff]   ;;  %v1725_v15 = vld [vmem:[#allocation8 + $0x8] sm:$0xff]   ;;  %v1711_v17 = vld [vmem:[#allocation3 + $0x18] sm:$0xff]   ;;  %p1835_p7 = por %p1834_p6, %p1833_p5 }
  0x4f   :  { %1528 = vmatpush3.bf16.msra.mxu0 %v1701_v1  ;;  %1678 = vmatpush3.bf16.msra.mxu1 %v1701_v1  ;;  %v1726_v16 = vld [vmem:[#allocation8 + $0x10] sm:$0xff]   ;;  %v1719_v18 = vld [vmem:[#allocation3 + $0x58] sm:$0xff]   ;;  %v1712_v19 = vld [vmem:[#allocation3 + $0x20] sm:$0xff]  }
  0x50   :  { %1529 = vmatprep.subr.bf16.mxu0 %v1702_v2  ;;  %1671 = vmatprep.subr.bf16.mxu1 %v1702_v2  ;;  %v1720_v20 = vld [vmem:[#allocation3 + $0x60] sm:$0xff]   ;;  %v1727_v21 = vld [vmem:[#allocation8 + $0x18] sm:$0xff]   ;;  %v1713_v23 = vld [vmem:[#allocation3 + $0x28] sm:$0xff]   ;;  %p1836_p8 = pnand %p1835_p7, %p1829_p4 }
  0x51   :  { %v1728_v22 = vld [vmem:[#allocation8 + $0x20] sm:$0xff]   ;;  %v1721_v24 = vld [vmem:[#allocation3 + $0x68] sm:$0xff]   ;;  %v1714_v25 = vld [vmem:[#allocation3 + $0x30] sm:$0xff]  }
  0x52   :  { %v1722_v26 = vld [vmem:[#allocation3 + $0x70] sm:$0xff]   ;;  %v1729_v27 = vld [vmem:[#allocation8 + $0x28] sm:$0xff]   ;;  %v1715_v28 = vld [vmem:[#allocation3 + $0x38] sm:$0xff]  }
  0x53   :  { %1530 = vmatpush3.bf16.msra.mxu0 %v1702_v2  ;;  %1679 = vmatpush3.bf16.msra.mxu1 %v1702_v2  ;;  %v1723_v29 = vld [vmem:[#allocation3 + $0x78] sm:$0xff]   ;;  %v1730_v30 = vld [vmem:[#allocation8 + $0x30] sm:$0xff]   ;;  %v1732_v32 = vld [vmem:[#allocation9] sm:$0xff]  }
  0x54   :  { %1531 = vmatprep.subr.bf16.mxu0 %v1703_v3  ;;  %1672 = vmatprep.subr.bf16.mxu1 %v1703_v3  ;;  %v1731_v31 = vld [vmem:[#allocation8 + $0x38] sm:$0xff]   ;;  %v1733_v33 = vld [vmem:[#allocation9 + $0x8] sm:$0xff]   ;;  %v1734_v34 = vld [vmem:[#allocation9 + $0x10] sm:$0xff]  }
  0x55   :  { %v1735_v35 = vld [vmem:[#allocation9 + $0x18] sm:$0xff]   ;;  %v1736_v36 = vld [vmem:[#allocation9 + $0x20] sm:$0xff]   ;;  %v1737_v37 = vld [vmem:[#allocation9 + $0x28] sm:$0xff]  }
  0x56   :  { %v1986_v38 = vld [vmem:[%s2369_s2] ss:$0 sm:$0xff] }
  0x57   :  { %1532 = vmatpush3.bf16.msra.mxu0 %v1703_v3  ;;  %1680 = vmatpush3.bf16.msra.mxu1 %v1703_v3 }
  0x58   :  { %1533 = vmatprep.subr.bf16.mxu0 %v1704_v5  ;;  %1673 = vmatprep.subr.bf16.mxu1 %v1704_v5 }
  0x5b   :  { %1534 = vmatpush3.bf16.msra.mxu0 %v1704_v5  ;;  %1681 = vmatpush3.bf16.msra.mxu1 %v1704_v5 }
  0x5c   :  { %1535 = vmatprep.subr.bf16.mxu0 %v1705_v6  ;;  %1674 = vmatprep.subr.bf16.mxu1 %v1705_v6 }
  0x5f   :  { %1536 = vmatpush3.bf16.msra.mxu0 %v1705_v6  ;;  %1682 = vmatpush3.bf16.msra.mxu1 %v1705_v6 }
  0x60   :  { %1537 = vmatprep.subr.bf16.mxu0 %v1706_v8  ;;  %1675 = vmatprep.subr.bf16.mxu1 %v1706_v8 }
  0x63   :  { %1538 = vmatpush3.bf16.msra.mxu0 %v1706_v8  ;;  %1683 = vmatpush3.bf16.msra.mxu1 %v1706_v8 }
  0x64   :  { %1539 = vmatprep.subr.bf16.mxu0 %v1707_v9  ;;  %1676 = vmatprep.subr.bf16.mxu1 %v1707_v9 }
  0x67   :  { %1540 = vmatpush3.bf16.msra.mxu0 %v1707_v9  ;;  %1684 = vmatpush3.bf16.msra.mxu1 %v1707_v9 }
  0x68   :  { %1573 = vmatprep.subr.bf16.mxu1 %v1724_v12  ;;  %1621 = vmatprep.subr.bf16.mxu0 %v1732_v32 }
  0x6a   :  { %1542 = vmatmul.mubr.bf16.vlgmr.msra.gmra.mrb[0].mxu0 %v1709_v10  ;;  %1558 = vmatmul.mubr.bf16.vlgmr.msra.gmra.mrb[0].mxu1 %v1717_v11 }
  0x6b   :  { %1545 = vmatprep.mubr.bf16.mxu0 %v1710_v13  ;;  %1561 = vmatprep.mubr.bf16.mxu1 %v1718_v14 }
  0x6c   :  { %1574 = vmatpush3.bf16.msra.mxu1 %v1724_v12  ;;  %1622 = vmatpush3.bf16.msra.mxu0 %v1732_v32 }
  0x6d   :  { %1575 = vmatprep.subr.bf16.mxu1 %v1725_v15  ;;  %1623 = vmatprep.subr.bf16.mxu0 %v1733_v33 }
  0x70   :  { %1576 = vmatpush3.bf16.msra.mxu1 %v1725_v15  ;;  %1624 = vmatpush3.bf16.msra.mxu0 %v1733_v33 }
  0x71   :  { %1577 = vmatprep.subr.bf16.mxu1 %v1726_v16  ;;  %1625 = vmatprep.subr.bf16.mxu0 %v1734_v34 }
  0x72   :  { %1546 = vmatmul.mubr.bf16.gmra.mrb[4].mxu0 %v1711_v17  ;;  %1562 = vmatmul.mubr.bf16.gmra.mrb[4].mxu1 %v1719_v18 }
  0x73   :  { %1549 = vmatprep.mubr.bf16.mxu0 %v1712_v19  ;;  %1565 = vmatprep.mubr.bf16.mxu1 %v1720_v20 }
  0x74   :  { %1578 = vmatpush3.bf16.msra.mxu1 %v1726_v16  ;;  %1626 = vmatpush3.bf16.msra.mxu0 %v1734_v34 }
  0x75   :  { %1579 = vmatprep.subr.bf16.mxu1 %v1727_v21  ;;  %1627 = vmatprep.subr.bf16.mxu0 %v1735_v35 }
  0x78   :  { %1580 = vmatpush3.bf16.msra.mxu1 %v1727_v21  ;;  %1628 = vmatpush3.bf16.msra.mxu0 %v1735_v35 }
  0x79   :  { %1581 = vmatprep.subr.bf16.mxu1 %v1728_v22  ;;  %1629 = vmatprep.subr.bf16.mxu0 %v1736_v36 }
  0x7a   :  { %1550 = vmatmul.mubr.bf16.gmra.mrb[8].mxu0 %v1713_v23  ;;  %1566 = vmatmul.mubr.bf16.gmra.mrb[8].mxu1 %v1721_v24 }
  0x7b   :  { %1553 = vmatprep.mubr.bf16.mxu0 %v1714_v25  ;;  %1569 = vmatprep.mubr.bf16.mxu1 %v1722_v26 }
  0x7c   :  { %1582 = vmatpush3.bf16.msra.mxu1 %v1728_v22  ;;  %1630 = vmatpush3.bf16.msra.mxu0 %v1736_v36 }
  0x7d   :  { %1583 = vmatprep.subr.bf16.mxu1 %v1729_v27  ;;  %1631 = vmatprep.subr.bf16.mxu0 %v1737_v37 }
  0x80   :  { %1584 = vmatpush3.bf16.msra.mxu1 %v1729_v27  ;;  %1632 = vmatpush3.bf16.msra.mxu0 %v1737_v37 }
  0x81   :  { %1585 = vmatprep.subr.bf16.mxu1 %v1730_v30 }
  0x82   :  { %1554 = vmatmul.mubr.bf16.gmra.mrb[12].mxu0 %v1715_v28  ;;  %1570 = vmatmul.mubr.bf16.gmra.mrb[12].mxu1 %v1723_v29 }
  0x84   :  { %1586 = vmatpush3.bf16.msra.mxu1 %v1730_v30 }
  0x85   :  { %1587 = vmatprep.subr.bf16.mxu1 %v1731_v31 }
  0x88   :  { %1588 = vmatpush3.bf16.msra.mxu1 %v1731_v31 }
 0x13d   :  { %v1543_v39 = vpop.f32.mrb[0].mxu0  ;;  %v1559_v40 = vpop.f32.mrb[0].mxu1 }
 0x13e   :  { %v330_v41 = vadd.f32 %v1543_v39, %v1986_v38  ;;  %v321_v42 = vpop.f32.mrb[1].mxu0  ;;  %v394_v43 = vadd.f32 %v1559_v40, %v1986_v38  ;;  %v385_v44 = vpop.f32.mrb[1].mxu1 }
 0x13f   :  { %v322_v45 = vadd.f32 %v1986_v38, %v321_v42  ;;  %v1544_v46 = vpop.f32.mrb[2].mxu0  ;;  %v386_v47 = vadd.f32 %v1986_v38, %v385_v44  ;;  %v1560_v48 = vpop.f32.mrb[2].mxu1 }
 0x140   :  { %v333_v49 = vadd.f32 %v1544_v46, %v1986_v38  ;;  %v324_v50 = vpop.f32.mrb[3].mxu0  ;;  %v466_v51 = vmax.f32 %v394_v43, 0.0  ;;  %v397_v52 = vadd.f32 %v1560_v48, %v1986_v38  ;;  %v388_v53 = vpop.f32.mrb[3].mxu1  ;;  %v450_v57 = vmax.f32 %v330_v41, 0.0 }
 0x141   :  { %v325_v54 = vadd.f32 %v1986_v38, %v324_v50  ;;  %v464_v55 = vmax.f32 %v386_v47, 0.0  ;;  %v389_v56 = vadd.f32 %v1986_v38, %v388_v53  ;;  %v448_v60 = vmax.f32 %v322_v45, 0.0 }
 0x142   :  { %v451_v58 = vmax.f32 %v333_v49, 0.0  ;;  %v467_v59 = vmax.f32 %v397_v52, 0.0 }
 0x143   :  { %v449_v61 = vmax.f32 %v325_v54, 0.0  ;;  %v465_v62 = vmax.f32 %v389_v56, 0.0 }
 0x144   :  { %v481_v63 = vpack.c.bf16 %v451_v58, %v450_v57  ;;  %v1996_v0 = vpack.c.bf16 %v467_v59, %v466_v51 }
 0x145   :  { %v480_v1 = vpack.c.bf16 %v449_v61, %v448_v60  ;;  %v1547_v2 = vpop.f32.mrb[4].mxu0  ;;  %v1998_v3 = vpack.c.bf16 %v465_v62, %v464_v55  ;;  %v1563_v4 = vpop.f32.mrb[4].mxu1 }
 0x146   :  { %v346_v5 = vadd.f32 %v1547_v2, %v1986_v38  ;;  %v337_v6 = vpop.f32.mrb[5].mxu0  ;;  %v410_v7 = vadd.f32 %v1563_v4, %v1986_v38  ;;  %v401_v8 = vpop.f32.mrb[5].mxu1 }
 0x147   :  { %v338_v9 = vadd.f32 %v1986_v38, %v337_v6  ;;  %v1548_v10 = vpop.f32.mrb[6].mxu0  ;;  %1589 = vmatprep.mubr.bf16.mxu1 %v480_v1  ;;  %v402_v11 = vadd.f32 %v1986_v38, %v401_v8  ;;  %v1564_v12 = vpop.f32.mrb[6].mxu1 }
 0x148   :  { %v349_v13 = vadd.f32 %v1548_v10, %v1986_v38  ;;  %v340_v14 = vpop.f32.mrb[7].mxu0  ;;  %1590 = vmatmul.mubr.bf16.vlgmr.msra.gmra.mrb[16].mxu1 %v481_v63  ;;  %v470_v15 = vmax.f32 %v410_v7, 0.0  ;;  %v413_v16 = vadd.f32 %v1564_v12, %v1986_v38  ;;  %v404_v17 = vpop.f32.mrb[7].mxu1  ;;  %v454_v21 = vmax.f32 %v346_v5, 0.0 }
 0x149   :  { %v341_v18 = vadd.f32 %v1986_v38, %v340_v14  ;;  %v468_v19 = vmax.f32 %v402_v11, 0.0  ;;  %v405_v20 = vadd.f32 %v1986_v38, %v404_v17  ;;  %v452_v24 = vmax.f32 %v338_v9, 0.0 }
 0x14a   :  { %v455_v22 = vmax.f32 %v349_v13, 0.0  ;;  %v471_v23 = vmax.f32 %v413_v16, 0.0 }
 0x14b   :  { %v453_v25 = vmax.f32 %v341_v18, 0.0  ;;  %v469_v26 = vmax.f32 %v405_v20, 0.0 }
 0x14c   :  { %v483_v27 = vpack.c.bf16 %v455_v22, %v454_v21  ;;  %v2008_v28 = vpack.c.bf16 %v471_v23, %v470_v15 }
 0x14d   :  { %v482_v29 = vpack.c.bf16 %v453_v25, %v452_v24  ;;  %v1551_v30 = vpop.f32.mrb[8].mxu0  ;;  %v2010_v31 = vpack.c.bf16 %v469_v26, %v468_v19  ;;  %v1567_v32 = vpop.f32.mrb[8].mxu1  ;;  %v1739_v26 = vld [vmem:[#allocation9 + $0x38] sm:$0xff]  }
 0x14e   :  { %v362_v33 = vadd.f32 %v1551_v30, %v1986_v38  ;;  %v353_v34 = vpop.f32.mrb[9].mxu0  ;;  %v426_v35 = vadd.f32 %v1567_v32, %v1986_v38  ;;  %v417_v36 = vpop.f32.mrb[9].mxu1 }
 0x14f   :  { %v354_v37 = vadd.f32 %v1986_v38, %v353_v34  ;;  %v1552_v39 = vpop.f32.mrb[10].mxu0  ;;  %1593 = vmatprep.mubr.bf16.mxu1 %v482_v29  ;;  %v418_v40 = vadd.f32 %v1986_v38, %v417_v36  ;;  %v1568_v41 = vpop.f32.mrb[10].mxu1 }
 0x150   :  { %v365_v42 = vadd.f32 %v1552_v39, %v1986_v38  ;;  %v356_v43 = vpop.f32.mrb[11].mxu0  ;;  %1594 = vmatmul.mubr.bf16.gmra.mrb[20].mxu1 %v483_v27  ;;  %v474_v44 = vmax.f32 %v426_v35, 0.0  ;;  %v429_v45 = vadd.f32 %v1568_v41, %v1986_v38  ;;  %v420_v46 = vpop.f32.mrb[11].mxu1  ;;  %v458_v50 = vmax.f32 %v362_v33, 0.0 }
 0x151   :  { %v357_v47 = vadd.f32 %v1986_v38, %v356_v43  ;;  %v472_v48 = vmax.f32 %v418_v40, 0.0  ;;  %v421_v49 = vadd.f32 %v1986_v38, %v420_v46  ;;  %v456_v53 = vmax.f32 %v354_v37, 0.0 }
 0x152   :  { %v459_v51 = vmax.f32 %v365_v42, 0.0  ;;  %v475_v52 = vmax.f32 %v429_v45, 0.0 }
 0x153   :  { %v457_v54 = vmax.f32 %v357_v47, 0.0  ;;  %v473_v55 = vmax.f32 %v421_v49, 0.0 }
 0x154   :  { %v485_v56 = vpack.c.bf16 %v459_v51, %v458_v50  ;;  %v493_v57 = vpack.c.bf16 %v475_v52, %v474_v44 }
 0x155   :  { %v484_v58 = vpack.c.bf16 %v457_v54, %v456_v53  ;;  %v1555_v59 = vpop.f32.mrb[12].mxu0  ;;  %v492_v60 = vpack.c.bf16 %v473_v55, %v472_v48  ;;  %v1571_v61 = vpop.f32.mrb[12].mxu1 }
 0x156   :  { %v378_v62 = vadd.f32 %v1555_v59, %v1986_v38  ;;  %v369_v63 = vpop.f32.mrb[13].mxu0  ;;  %v442_v1 = vadd.f32 %v1571_v61, %v1986_v38  ;;  %v433_v2 = vpop.f32.mrb[13].mxu1 }
 0x157   :  { %v370_v4 = vadd.f32 %v1986_v38, %v369_v63  ;;  %v1556_v5 = vpop.f32.mrb[14].mxu0  ;;  %1597 = vmatprep.mubr.bf16.mxu1 %v484_v58  ;;  %v434_v6 = vadd.f32 %v1986_v38, %v433_v2  ;;  %v1572_v7 = vpop.f32.mrb[14].mxu1 }
 0x158   :  { %v381_v8 = vadd.f32 %v1556_v5, %v1986_v38  ;;  %v372_v9 = vpop.f32.mrb[15].mxu0  ;;  %1598 = vmatmul.mubr.bf16.gmra.mrb[24].mxu1 %v485_v56  ;;  %v478_v10 = vmax.f32 %v442_v1, 0.0  ;;  %v445_v11 = vadd.f32 %v1572_v7, %v1986_v38  ;;  %v436_v12 = vpop.f32.mrb[15].mxu1  ;;  %v462_v16 = vmax.f32 %v378_v62, 0.0 }
 0x159   :  { %v373_v13 = vadd.f32 %v1986_v38, %v372_v9  ;;  %v476_v14 = vmax.f32 %v434_v6, 0.0  ;;  %v437_v15 = vadd.f32 %v1986_v38, %v436_v12  ;;  %v460_v19 = vmax.f32 %v370_v4, 0.0  ;;  %v1738_v38 = vld [vmem:[#allocation9 + $0x30] sm:$0xff]  }
 0x15a   :  { %v463_v17 = vmax.f32 %v381_v8, 0.0  ;;  %v479_v18 = vmax.f32 %v445_v11, 0.0  ;;  %1633 = vmatprep.subr.bf16.mxu0 %v1738_v38 }
 0x15b   :  { %v461_v20 = vmax.f32 %v373_v13, 0.0  ;;  %v477_v21 = vmax.f32 %v437_v15, 0.0  ;;  %1634 = vmatpush3.bf16.msra.mxu0 %v1738_v38 }
 0x15c   :  { %v487_v22 = vpack.c.bf16 %v463_v17, %v462_v16  ;;  %v495_v23 = vpack.c.bf16 %v479_v18, %v478_v10  ;;  %1635 = vmatprep.subr.bf16.mxu0 %v1739_v26 }
 0x15d   :  { %v486_v24 = vpack.c.bf16 %v461_v20, %v460_v19  ;;  %v494_v25 = vpack.c.bf16 %v477_v21, %v476_v14 }
 0x15f   :  { %1601 = vmatprep.mubr.bf16.mxu1 %v486_v24  ;;  %1636 = vmatpush3.bf16.msra.mxu0 %v1739_v26 }
 0x160   :  { %1602 = vmatmul.mubr.bf16.gmra.mrb[28].mxu1 %v487_v22 }
 0x161   :  { %1605 = vmatprep.mubr.bf16.mxu1 %v1998_v3  ;;  %v2035_v3 = vld [vmem:[%s2371_s4] ss:$0 sm:$0xff] }
 0x168   :  { %1606 = vmatmul.mubr.bf16.gmra.mrb[32].mxu1 %v1996_v0 }
 0x169   :  { %1609 = vmatprep.mubr.bf16.mxu1 %v2010_v31 }
 0x170   :  { %1610 = vmatmul.mubr.bf16.gmra.mrb[36].mxu1 %v2008_v28 }
 0x171   :  { %1613 = vmatprep.mubr.bf16.mxu1 %v492_v60 }
 0x178   :  { %1614 = vmatmul.mubr.bf16.gmra.mrb[40].mxu1 %v493_v57 }
 0x179   :  { %1617 = vmatprep.mubr.bf16.mxu1 %v494_v25 }
 0x180   :  { %1618 = vmatmul.mubr.bf16.gmra.mrb[44].mxu1 %v495_v23 }
 0x21b   :  { %v1591_v0 = vpop.f32.mrb[16].mxu1 }
 0x21c   :  { %v610_v27 = vadd.f32 %v1591_v0, %v2035_v3  ;;  %v601_v29 = vpop.f32.mrb[17].mxu1 }
 0x21d   :  { %v602_v28 = vadd.f32 %v2035_v3, %v601_v29  ;;  %v1592_v30 = vpop.f32.mrb[18].mxu1 }
 0x21e   :  { %v613_v31 = vadd.f32 %v1592_v30, %v2035_v3  ;;  %v604_v32 = vpop.f32.mrb[19].mxu1  ;;  %v730_v34 = vmax.f32 %v610_v27, 0.0 }
 0x21f   :  { %v605_v33 = vadd.f32 %v2035_v3, %v604_v32  ;;  %v728_v36 = vmax.f32 %v602_v28, 0.0 }
 0x220   :  { %v731_v35 = vmax.f32 %v613_v31, 0.0 }
 0x221   :  { %v729_v37 = vmax.f32 %v605_v33, 0.0 }
 0x222   :  { %v761_v39 = vpack.c.bf16 %v731_v35, %v730_v34 }
 0x223   :  { %v760_v40 = vpack.c.bf16 %v729_v37, %v728_v36  ;;  %v1595_v41 = vpop.f32.mrb[20].mxu1 }
 0x224   :  { %v626_v42 = vadd.f32 %v1595_v41, %v2035_v3  ;;  %v617_v43 = vpop.f32.mrb[21].mxu1 }
 0x225   :  { %v618_v44 = vadd.f32 %v2035_v3, %v617_v43  ;;  %v1596_v45 = vpop.f32.mrb[22].mxu1  ;;  %1637 = vmatprep.mubr.bf16.mxu0 %v760_v40 }
 0x226   :  { %v629_v46 = vadd.f32 %v1596_v45, %v2035_v3  ;;  %v620_v47 = vpop.f32.mrb[23].mxu1  ;;  %1638 = vmatmul.mubr.bf16.vlgmr.msra.gmra.mrb[16].mxu0 %v761_v39  ;;  %v734_v49 = vmax.f32 %v626_v42, 0.0 }
 0x227   :  { %v621_v48 = vadd.f32 %v2035_v3, %v620_v47  ;;  %v732_v51 = vmax.f32 %v618_v44, 0.0 }
 0x228   :  { %v735_v50 = vmax.f32 %v629_v46, 0.0 }
 0x229   :  { %v733_v52 = vmax.f32 %v621_v48, 0.0 }
 0x22a   :  { %v763_v53 = vpack.c.bf16 %v735_v50, %v734_v49 }
 0x22b   :  { %v762_v54 = vpack.c.bf16 %v733_v52, %v732_v51  ;;  %v1599_v55 = vpop.f32.mrb[24].mxu1 }
 0x22c   :  { %v642_v56 = vadd.f32 %v1599_v55, %v2035_v3  ;;  %v633_v57 = vpop.f32.mrb[25].mxu1 }
 0x22d   :  { %v634_v58 = vadd.f32 %v2035_v3, %v633_v57  ;;  %v1600_v59 = vpop.f32.mrb[26].mxu1  ;;  %1641 = vmatprep.mubr.bf16.mxu0 %v762_v54 }
 0x22e   :  { %v645_v60 = vadd.f32 %v1600_v59, %v2035_v3  ;;  %v636_v61 = vpop.f32.mrb[27].mxu1  ;;  %1642 = vmatmul.mubr.bf16.gmra.mrb[20].mxu0 %v763_v53  ;;  %v738_v63 = vmax.f32 %v642_v56, 0.0 }
 0x22f   :  { %v637_v62 = vadd.f32 %v2035_v3, %v636_v61  ;;  %v736_v2 = vmax.f32 %v634_v58, 0.0 }
 0x230   :  { %v739_v1 = vmax.f32 %v645_v60, 0.0 }
 0x231   :  { %v737_v4 = vmax.f32 %v637_v62, 0.0 }
 0x232   :  { %v765_v5 = vpack.c.bf16 %v739_v1, %v738_v63 }
 0x233   :  { %v764_v6 = vpack.c.bf16 %v737_v4, %v736_v2  ;;  %v1603_v7 = vpop.f32.mrb[28].mxu1 }
 0x234   :  { %v658_v8 = vadd.f32 %v1603_v7, %v2035_v3  ;;  %v649_v9 = vpop.f32.mrb[29].mxu1 }
 0x235   :  { %v650_v10 = vadd.f32 %v2035_v3, %v649_v9  ;;  %v1604_v11 = vpop.f32.mrb[30].mxu1  ;;  %1645 = vmatprep.mubr.bf16.mxu0 %v764_v6 }
 0x236   :  { %v661_v12 = vadd.f32 %v1604_v11, %v2035_v3  ;;  %v652_v13 = vpop.f32.mrb[31].mxu1  ;;  %1646 = vmatmul.mubr.bf16.gmra.mrb[24].mxu0 %v765_v5  ;;  %v742_v15 = vmax.f32 %v658_v8, 0.0 }
 0x237   :  { %v653_v14 = vadd.f32 %v2035_v3, %v652_v13  ;;  %v740_v17 = vmax.f32 %v650_v10, 0.0 }
 0x238   :  { %v743_v16 = vmax.f32 %v661_v12, 0.0 }
 0x239   :  { %v741_v18 = vmax.f32 %v653_v14, 0.0  ;;  %v1864_v14 = vmov 0  }
 0x23a   :  { %v767_v19 = vpack.c.bf16 %v743_v16, %v742_v15  ;;  %1698 = vset.pattern.permute.xlu1 %v1864_v14  ;;  %1699 = vset.pattern.permute.xlu0 %v1864_v14  ;;  %v1865_v15 = vmov 0.0   ;;  %v2072_v16 = vld [vmem:[%s2373_s6] ss:$0 sm:$0xff] }
 0x23b   :  { %v766_v20 = vpack.c.bf16 %v741_v18, %v740_v17  ;;  %v1607_v21 = vpop.f32.mrb[32].mxu1  ;;  %87 = vst [vmem:[#allocation2] sm:$0x1] %v1865_v15 }
 0x23c   :  { %v674_v22 = vadd.f32 %v1607_v21, %v2035_v3  ;;  %v665_v23 = vpop.f32.mrb[33].mxu1 }
 0x23d   :  { %v666_v24 = vadd.f32 %v2035_v3, %v665_v23  ;;  %v1608_v25 = vpop.f32.mrb[34].mxu1  ;;  %1649 = vmatprep.mubr.bf16.mxu0 %v766_v20 }
 0x23e   :  { %v677_v38 = vadd.f32 %v1608_v25, %v2035_v3  ;;  %v668_v26 = vpop.f32.mrb[35].mxu1  ;;  %1650 = vmatmul.mubr.bf16.gmra.mrb[28].mxu0 %v767_v19  ;;  %v746_v27 = vmax.f32 %v674_v22, 0.0 }
 0x23f   :  { %v669_v0 = vadd.f32 %v2035_v3, %v668_v26  ;;  %v744_v28 = vmax.f32 %v666_v24, 0.0 }
 0x240   :  { %v747_v29 = vmax.f32 %v677_v38, 0.0 }
 0x241   :  { %v745_v30 = vmax.f32 %v669_v0, 0.0 }
 0x242   :  { %v769_v31 = vpack.c.bf16 %v747_v29, %v746_v27 }
 0x243   :  { %v768_v32 = vpack.c.bf16 %v745_v30, %v744_v28  ;;  %v1611_v33 = vpop.f32.mrb[36].mxu1 }
 0x244   :  { %v690_v34 = vadd.f32 %v1611_v33, %v2035_v3  ;;  %v681_v35 = vpop.f32.mrb[37].mxu1 }
 0x245   :  { %v682_v36 = vadd.f32 %v2035_v3, %v681_v35  ;;  %v1612_v37 = vpop.f32.mrb[38].mxu1  ;;  %1653 = vmatprep.mubr.bf16.mxu0 %v768_v32 }
 0x246   :  { %v693_v39 = vadd.f32 %v1612_v37, %v2035_v3  ;;  %v684_v40 = vpop.f32.mrb[39].mxu1  ;;  %1654 = vmatmul.mubr.bf16.gmra.mrb[32].mxu0 %v769_v31  ;;  %v750_v42 = vmax.f32 %v690_v34, 0.0 }
 0x247   :  { %v685_v41 = vadd.f32 %v2035_v3, %v684_v40  ;;  %v748_v44 = vmax.f32 %v682_v36, 0.0 }
 0x248   :  { %v751_v43 = vmax.f32 %v693_v39, 0.0 }
 0x249   :  { %v749_v45 = vmax.f32 %v685_v41, 0.0 }
 0x24a   :  { %v771_v46 = vpack.c.bf16 %v751_v43, %v750_v42 }
 0x24b   :  { %v770_v47 = vpack.c.bf16 %v749_v45, %v748_v44  ;;  %v1615_v48 = vpop.f32.mrb[40].mxu1 }
 0x24c   :  { %v706_v49 = vadd.f32 %v1615_v48, %v2035_v3  ;;  %v697_v50 = vpop.f32.mrb[41].mxu1 }
 0x24d   :  { %v698_v51 = vadd.f32 %v2035_v3, %v697_v50  ;;  %v1616_v52 = vpop.f32.mrb[42].mxu1  ;;  %1657 = vmatprep.mubr.bf16.mxu0 %v770_v47 }
 0x24e   :  { %v709_v53 = vadd.f32 %v1616_v52, %v2035_v3  ;;  %v700_v54 = vpop.f32.mrb[43].mxu1  ;;  %1658 = vmatmul.mubr.bf16.gmra.mrb[36].mxu0 %v771_v46  ;;  %v754_v56 = vmax.f32 %v706_v49, 0.0 }
 0x24f   :  { %v701_v55 = vadd.f32 %v2035_v3, %v700_v54  ;;  %v752_v58 = vmax.f32 %v698_v51, 0.0 }
 0x250   :  { %v755_v57 = vmax.f32 %v709_v53, 0.0 }
 0x251   :  { %v753_v59 = vmax.f32 %v701_v55, 0.0 }
 0x252   :  { %v773_v60 = vpack.c.bf16 %v755_v57, %v754_v56 }
 0x253   :  { %v772_v61 = vpack.c.bf16 %v753_v59, %v752_v58  ;;  %v1619_v62 = vpop.f32.mrb[44].mxu1 }
 0x254   :  { %v722_v63 = vadd.f32 %v1619_v62, %v2035_v3  ;;  %v713_v1 = vpop.f32.mrb[45].mxu1 }
 0x255   :  { %v714_v2 = vadd.f32 %v2035_v3, %v713_v1  ;;  %v1620_v4 = vpop.f32.mrb[46].mxu1  ;;  %1661 = vmatprep.mubr.bf16.mxu0 %v772_v61 }
 0x256   :  { %v725_v5 = vadd.f32 %v1620_v4, %v2035_v3  ;;  %v716_v6 = vpop.f32.mrb[47].mxu1  ;;  %1662 = vmatmul.mubr.bf16.gmra.mrb[40].mxu0 %v773_v60  ;;  %v758_v8 = vmax.f32 %v722_v63, 0.0 }
 0x257   :  { %v717_v7 = vadd.f32 %v2035_v3, %v716_v6  ;;  %v756_v10 = vmax.f32 %v714_v2, 0.0 }
 0x258   :  { %v759_v9 = vmax.f32 %v725_v5, 0.0 }
 0x259   :  { %v757_v11 = vmax.f32 %v717_v7, 0.0 }
 0x25a   :  { %v775_v12 = vpack.c.bf16 %v759_v9, %v758_v8 }
 0x25b   :  { %v774_v13 = vpack.c.bf16 %v757_v11, %v756_v10 }
 0x25d   :  { %1665 = vmatprep.mubr.bf16.mxu0 %v774_v13 }
 0x25e   :  { %1666 = vmatmul.mubr.bf16.gmra.mrb[44].mxu0 %v775_v12 }
 0x2f9   :  { %v1639_v17 = vpop.f32.mrb[16].mxu0 }
 0x2fa   :  { %v2075_v3 = vadd.f32 %v1639_v17, %v2072_v16  ;;  %v881_v18 = vpop.f32.mrb[17].mxu0 }
 0x2fb   :  { %v2078_v19 = vadd.f32 %v2072_v16, %v881_v18  ;;  %v1640_v20 = vpop.f32.mrb[18].mxu0 }
 0x2fc   :  { %1021 = vperm.xlu1 %1698, %v2075_v3   ;;  %v884_v21 = vpop.f32.mrb[19].mxu0  ;;  %v2086_v23 = vadd.f32 %v1640_v20, %v2072_v16 }
 0x2fd   :  { %v2082_v22 = vadd.f32 %v2072_v16, %v884_v21  ;;  %1011 = vperm.xlu0 %1699, %v2078_v19  }
 0x2ff   :  { %v1235_v24 = vadd.f32 %v2082_v22, %v2078_v19 }
 0x300   :  { %1026 = vperm.xlu1 %1698, %v2086_v23  }
 0x301   :  { %v1236_v25 = vadd.f32 %v1235_v24, %v2075_v3  ;;  %v1643_v38 = vpop.f32.mrb[20].mxu0 }
 0x302   :  { %v897_v26 = vpop.f32.mrb[21].mxu0  ;;  %v2102_v32 = vadd.f32 %v1643_v38, %v2072_v16 }
 0x303   :  { %v2093_v0 = vadd.f32 %v2072_v16, %v897_v26  ;;  %v1237_v27 = vadd.f32 %v1236_v25, %v2086_v23  ;;  %v1644_v29 = vpop.f32.mrb[22].mxu0 }
 0x304   :  { %v900_v28 = vpop.f32.mrb[23].mxu0  ;;  %1016 = vperm.xlu1 %1698, %v2082_v22   ;;  %v2107_v34 = vadd.f32 %v1644_v29, %v2072_v16 }
 0x305   :  { %v1238_v30 = vadd.f32 %v1237_v27, %v2093_v0  ;;  %v2099_v31 = vadd.f32 %v2072_v16, %v900_v28 }
 0x307   :  { %v1239_v33 = vadd.f32 %v1238_v30, %v2099_v31 }
 0x308   :  { %1041 = vperm.xlu1 %1698, %v2102_v32  }
 0x309   :  { %v1240_v35 = vadd.f32 %v1239_v33, %v2102_v32  ;;  %v1647_v36 = vpop.f32.mrb[24].mxu0 }
 0x30a   :  { %v913_v37 = vpop.f32.mrb[25].mxu0  ;;  %v2120_v45 = vadd.f32 %v1647_v36, %v2072_v16 }
 0x30b   :  { %v2111_v39 = vadd.f32 %v2072_v16, %v913_v37  ;;  %v1241_v40 = vadd.f32 %v1240_v35, %v2107_v34  ;;  %v1648_v41 = vpop.f32.mrb[26].mxu0 }
 0x30c   :  { %v916_v42 = vpop.f32.mrb[27].mxu0  ;;  %1031 = vperm.xlu1 %1698, %v2093_v0   ;;  %v2125_v47 = vadd.f32 %v1648_v41, %v2072_v16 }
 0x30d   :  { %v1242_v43 = vadd.f32 %v1241_v40, %v2111_v39  ;;  %v2117_v44 = vadd.f32 %v2072_v16, %v916_v42 }
 0x30f   :  { %v1243_v46 = vadd.f32 %v1242_v43, %v2117_v44 }
 0x310   :  { %1046 = vperm.xlu1 %1698, %v2107_v34  }
 0x311   :  { %v1244_v48 = vadd.f32 %v1243_v46, %v2120_v45  ;;  %v1651_v49 = vpop.f32.mrb[28].mxu0 }
 0x312   :  { %v929_v50 = vpop.f32.mrb[29].mxu0  ;;  %v2138_v57 = vadd.f32 %v1651_v49, %v2072_v16 }
 0x313   :  { %v2129_v51 = vadd.f32 %v2072_v16, %v929_v50  ;;  %v1245_v52 = vadd.f32 %v1244_v48, %v2125_v47  ;;  %v1652_v53 = vpop.f32.mrb[30].mxu0 }
 0x314   :  { %v932_v54 = vpop.f32.mrb[31].mxu0  ;;  %1036 = vperm.xlu1 %1698, %v2099_v31   ;;  %v2144_v59 = vadd.f32 %v1652_v53, %v2072_v16 }
 0x315   :  { %v1246_v55 = vadd.f32 %v1245_v52, %v2129_v51  ;;  %v2135_v56 = vadd.f32 %v2072_v16, %v932_v54 }
 0x317   :  { %v1247_v58 = vadd.f32 %v1246_v55, %v2135_v56  ;;  %1076 = vperm.xlu0 %1699, %v2135_v56  }
 0x318   :  { %1061 = vperm.xlu1 %1698, %v2120_v45  }
 0x319   :  { %v1248_v60 = vadd.f32 %v1247_v58, %v2138_v57  ;;  %v1655_v61 = vpop.f32.mrb[32].mxu0 }
 0x31a   :  { %v945_v62 = vpop.f32.mrb[33].mxu0  ;;  %v2157_v7 = vadd.f32 %v1655_v61, %v2072_v16 }
 0x31b   :  { %v2148_v63 = vadd.f32 %v2072_v16, %v945_v62  ;;  %v1249_v1 = vadd.f32 %v1248_v60, %v2144_v59  ;;  %v1656_v2 = vpop.f32.mrb[34].mxu0 }
 0x31c   :  { %v948_v4 = vpop.f32.mrb[35].mxu0  ;;  %1051 = vperm.xlu1 %1698, %v2111_v39   ;;  %v2162_v9 = vadd.f32 %v1656_v2, %v2072_v16 }
 0x31d   :  { %v1250_v5 = vadd.f32 %v1249_v1, %v2148_v63  ;;  %v2154_v6 = vadd.f32 %v2072_v16, %v948_v4 }
 0x31e   :  { %2384 = vst [vmem:[#allocation17_spill] sm:$0xff] %v2162_v9 }
 0x31f   :  { %2383 = vst [vmem:[#allocation16_spill] sm:$0xff] %v2154_v6  ;;  %v1251_v8 = vadd.f32 %v1250_v5, %v2154_v6 }
 0x320   :  { %1066 = vperm.xlu1 %1698, %v2125_v47  }
 0x321   :  { %v1252_v10 = vadd.f32 %v1251_v8, %v2157_v7  ;;  %v1659_v11 = vpop.f32.mrb[36].mxu0 }
 0x322   :  { %v961_v12 = vpop.f32.mrb[37].mxu0  ;;  %v2175_v21 = vadd.f32 %v1659_v11, %v2072_v16 }
 0x323   :  { %v2166_v13 = vadd.f32 %v2072_v16, %v961_v12  ;;  %v1253_v14 = vadd.f32 %v1252_v10, %v2162_v9  ;;  %v1660_v15 = vpop.f32.mrb[38].mxu0  ;;  %v1234_v10 = vld [vmem:[#allocation2] sm:$0x1] }
 0x324   :  { %v964_v17 = vpop.f32.mrb[39].mxu0  ;;  %1056 = vperm.xlu1 %1698, %v2117_v44   ;;  %v2180_v25 = vadd.f32 %v1660_v15, %v2072_v16 }
 0x325   :  { %v1254_v18 = vadd.f32 %v1253_v14, %v2166_v13  ;;  %v2172_v20 = vadd.f32 %v2072_v16, %v964_v17 }
 0x326   :  { %2386 = vst [vmem:[#allocation19_spill] sm:$0xff] %v2180_v25 }
 0x327   :  { %2385 = vst [vmem:[#allocation18_spill] sm:$0xff] %v2172_v20  ;;  %v1255_v24 = vadd.f32 %v1254_v18, %v2172_v20 }
 0x328   :  { %1081 = vperm.xlu1 %1698, %v2138_v57  }
 0x329   :  { %v1256_v38 = vadd.f32 %v1255_v24, %v2175_v21  ;;  %v1663_v26 = vpop.f32.mrb[40].mxu0 }
 0x32a   :  { %v977_v27 = vpop.f32.mrb[41].mxu0  ;;  %v2193_v37 = vadd.f32 %v1663_v26, %v2072_v16 }
 0x32b   :  { %v2184_v29 = vadd.f32 %v2072_v16, %v977_v27  ;;  %v1257_v28 = vadd.f32 %v1256_v38, %v2180_v25  ;;  %v1664_v30 = vpop.f32.mrb[42].mxu0 }
 0x32c   :  { %v980_v33 = vpop.f32.mrb[43].mxu0  ;;  %1071 = vperm.xlu1 %1698, %v2129_v51   ;;  %v2198_v41 = vadd.f32 %v1664_v30, %v2072_v16 }
 0x32d   :  { %v1258_v35 = vadd.f32 %v1257_v28, %v2184_v29  ;;  %v2190_v36 = vadd.f32 %v2072_v16, %v980_v33 }
 0x32e   :  { %2388 = vst [vmem:[#allocation21_spill] sm:$0xff] %v2198_v41 }
 0x32f   :  { %2387 = vst [vmem:[#allocation20_spill] sm:$0xff] %v2190_v36  ;;  %v1259_v40 = vadd.f32 %v1258_v35, %v2190_v36 }
 0x330   :  { %1091 = vperm.xlu1 %1698, %v2148_v63  }
 0x331   :  { %v1260_v42 = vadd.f32 %v1259_v40, %v2193_v37  ;;  %v1667_v43 = vpop.f32.mrb[44].mxu0 }
 0x332   :  { %v993_v46 = vpop.f32.mrb[45].mxu0  ;;  %v2211_v55 = vadd.f32 %v1667_v43, %v2072_v16 }
 0x333   :  { %v2202_v48 = vadd.f32 %v2072_v16, %v993_v46  ;;  %v1261_v49 = vadd.f32 %v1260_v42, %v2198_v41  ;;  %v1668_v50 = vpop.f32.mrb[46].mxu0 }
 0x334   :  { %v996_v52 = vpop.f32.mrb[47].mxu0  ;;  %1101 = vperm.xlu1 %1698, %v2157_v7   ;;  %v2216_v60 = vadd.f32 %v1668_v50, %v2072_v16 }
 0x335   :  { %v1262_v53 = vadd.f32 %v1261_v49, %v2202_v48  ;;  %v2208_v54 = vadd.f32 %v2072_v16, %v996_v52  ;;  %v1277_v16 = vlaneseq }
 0x336   :  { %2390 = vst [vmem:[#allocation23_spill] sm:$0xff] %v2216_v60 }
 0x337   :  { %2389 = vst [vmem:[#allocation22_spill] sm:$0xff] %v2208_v54  ;;  %v1263_v58 = vadd.f32 %v1262_v53, %v2208_v54  ;;  %v1278_v14 = vand.u32 127, %v1277_v16 }
 0x338   :  { %1111 = vperm.xlu1 %1698, %v2166_v13  }
 0x339   :  { %v1264_v61 = vadd.f32 %v1263_v58, %v2211_v55  ;;  %vm1279_vm0 = vcmp.ge.s32.totalorder %v1278_v14, 1 }
 0x33b   :  { %v1265_v62 = vadd.f32 %v1264_v61, %v2216_v60 }
 0x33c   :  { %1121 = vperm.xlu1 %1698, %v2175_v21  }
 0x33d   :  { %v1266_v1 = vrot.slane %v1265_v62, 4 }
 0x33f   :  { %v1267_v2 = vadd.f32 %v1266_v1, %v1265_v62 }
 0x340   :  { %1131 = vperm.xlu1 %1698, %v2184_v29  }
 0x341   :  { %v1268_v4 = vrot.slane %v1267_v2, 2 }
 0x343   :  { %v1269_v5 = vadd.f32 %v1268_v4, %v1267_v2 }
 0x344   :  { %1141 = vperm.xlu1 %1698, %v2193_v37  }
 0x345   :  { %v1270_v8 = vrot.slane %v1269_v5, 1 }
 0x347   :  { %v1271_v11 = vadd.f32 %v1270_v8, %v1269_v5 }
 0x348   :  { %1151 = vperm.xlu1 %1698, %v2202_v48  }
 0x349   :  { %v1272_v12 = vadd.f32 %v1271_v11, %v1234_v10 }
 0x34b   :  { %1273 = vst [vmem:[#allocation2] sm:$0x1] %v1272_v12 }
 0x34c   :  { %1161 = vperm.xlu1 %1698, %v2211_v55  }
 0x352   :  { %v1280_v15 = vld [vmem:[#allocation2] sm:$0x1] }
 0x353   :  { %v1281_v17 = vsel %vm1279_vm0, %v1280_v15, 0.0 }
 0x354   :  { %v1283_v18 = vsel %vm1282_vm1, %v1281_v17, 0.0 }
 0x355   :  { %1284 = vadd.xlane.f32.xlu0 %v1283_v18 }
 0x36b   :  { %1086 = vperm.xlu0 %1699, %v2144_v59  }
 0x36f   :  { %1096 = vperm.xlu0 %1699, %v2154_v6  }
 0x373   :  { %1106 = vperm.xlu0 %1699, %v2162_v9  }
 0x377   :  { %1116 = vperm.xlu0 %1699, %v2172_v20  }
 0x37b   :  { %1126 = vperm.xlu0 %1699, %v2180_v25   ;;  %v1022_v24 = vpop.permute.xlu1 %1021 }
 0x37c   :  { %v1012_v42 = vpop.permute.xlu0 %1011 }
 0x37f   :  { %1136 = vperm.xlu0 %1699, %v2190_v36   ;;  %v1027_v38 = vpop.permute.xlu1 %1026 }
 0x383   :  { %1146 = vperm.xlu0 %1699, %v2198_v41   ;;  %v1017_v26 = vpop.permute.xlu1 %1016 }
 0x387   :  { %1156 = vperm.xlu0 %1699, %v2208_v54   ;;  %v1042_v27 = vpop.permute.xlu1 %1041 }
 0x38b   :  { %1166 = vperm.xlu0 %1699, %v2216_v60   ;;  %v1032_v28 = vpop.permute.xlu1 %1031 }
 0x38c   :  { %v1173_v36 = vadd.f32 %v1032_v28, %v2093_v0 }
 0x38f   :  { %v1047_v30 = vpop.permute.xlu1 %1046 }
 0x390   :  { %v1176_v25 = vadd.f32 %v1047_v30, %v2107_v34 }
 0x393   :  { %v1037_v33 = vpop.permute.xlu1 %1036 }
 0x394   :  { %v1174_v20 = vadd.f32 %v1037_v33, %v2099_v31 }
 0x396   :  { %v1077_v46 = vpop.permute.xlu0 %1076 }
 0x397   :  { %v1062_v35 = vpop.permute.xlu1 %1061  ;;  %v2243_v9 = vadd.f32 %v1077_v46, %v2135_v56 }
 0x398   :  { %v1179_v6 = vadd.f32 %v1062_v35, %v2120_v45 }
 0x39b   :  { %v1052_v40 = vpop.permute.xlu1 %1051 }
 0x39f   :  { %v1067_v43 = vpop.permute.xlu1 %1066 }
 0x3a3   :  { %v1057_v49 = vpop.permute.xlu1 %1056 }
 0x3a7   :  { %v1082_v61 = vpop.permute.xlu1 %1081 }
 0x3ab   :  { %v1072_v4 = vpop.permute.xlu1 %1071 }
 0x3ac   :  { %v1181_v0 = vadd.f32 %v1072_v4, %v2129_v51 }
 0x3af   :  { %v1092_v8 = vpop.permute.xlu1 %1091 }
 0x3b0   :  { %v2254_v34 = vadd.f32 %v1092_v8, %v2148_v63 }
 0x3b3   :  { %v1102_v11 = vpop.permute.xlu1 %1101 }
 0x3b4   :  { %v2257_v31 = vadd.f32 %v1102_v11, %v2157_v7  ;;  %v2391_v7 = vld [vmem:[#allocation16_spill] sm:$0xff] }
 0x3b7   :  { %v1112_v12 = vpop.permute.xlu1 %1111 }
 0x3b8   :  { %v2260_v45 = vadd.f32 %v1112_v12, %v2166_v13 }
 0x3bb   :  { %v1122_v15 = vpop.permute.xlu1 %1121 }
 0x3bf   :  { %v1132_v18 = vpop.permute.xlu1 %1131 }
 0x3c3   :  { %v1142_v54 = vpop.permute.xlu1 %1141 }
 0x3e2   :  { %v1285_v50 = vpop.xlane.xlu0 %1284 }
 0x3e3   :  { %v1286_v52 = vrot.slane %v1285_v50, 4 }
 0x3e5   :  { %v1287_v53 = vadd.f32 %v1286_v52, %v1285_v50  ;;  %v1152_v52 = vpop.permute.xlu1 %1151 }
 0x3e6   :  { %v2272_v51 = vadd.f32 %v1152_v52, %v2202_v48  ;;  %v2396_v48 = vld [vmem:[#allocation21_spill] sm:$0xff] }
 0x3e7   :  { %v1288_v58 = vrot.slane %v1287_v53, 2 }
 0x3e9   :  { %v1289_v62 = vadd.f32 %v1288_v58, %v1287_v53  ;;  %v1171_v53 = vadd.f32 %v1022_v24, %v2075_v3  ;;  %v1169_v58 = vadd.f32 %v1012_v42, %v2078_v19  ;;  %v1177_v3 = vadd.f32 %v1052_v40, %v2111_v39 }
 0x3ea   :  { %v1087_v5 = vpop.permute.xlu0 %1086  ;;  %v1180_v19 = vadd.f32 %v1067_v43, %v2125_v47  ;;  %v2263_v39 = vadd.f32 %v1122_v15, %v2175_v21  ;;  %v2269_v47 = vadd.f32 %v1142_v54, %v2193_v37  ;;  %v2392_v21 = vld [vmem:[#allocation17_spill] sm:$0xff]  ;;  %v2394_v37 = vld [vmem:[#allocation19_spill] sm:$0xff] }
 0x3eb   :  { %v1290_v1 = vrot.slane %v1289_v62, 1  ;;  %v1184_v63 = vadd.f32 %v1087_v5, %v2144_v59  ;;  %v2398_v59 = vld [vmem:[#allocation23_spill] sm:$0xff] }
 0x3ed   :  { %v1291_v2 = vadd.f32 %v1290_v1, %v1289_v62  ;;  %v1172_v62 = vadd.f32 %v1027_v38, %v2086_v23  ;;  %v1170_v1 = vadd.f32 %v1017_v26, %v2082_v22  ;;  %v1178_v23 = vadd.f32 %v1057_v49, %v2117_v44  ;;  %v1162_v22 = vpop.permute.xlu1 %1161  ;;  %v2395_v26 = vld [vmem:[#allocation20_spill] sm:$0xff] }
 0x3ee   :  { %v1097_v10 = vpop.permute.xlu0 %1096  ;;  %v2266_v44 = vadd.f32 %v1132_v18, %v2184_v29  ;;  %v2393_v29 = vld [vmem:[#allocation18_spill] sm:$0xff] }
 0x3ef   :  { %1685 = vpush %v1291_v2  ;;  %v1175_v2 = vadd.f32 %v1042_v27, %v2102_v32  ;;  %v2250_v32 = vadd.f32 %v1082_v61, %v2138_v57  ;;  %v2275_v57 = vadd.f32 %v1162_v22, %v2211_v55  ;;  %v1186_v13 = vadd.f32 %v1097_v10, %v2391_v7  ;;  %v2397_v55 = vld [vmem:[#allocation22_spill] sm:$0xff] }
 0x3f2   :  { %v1107_v16 = vpop.permute.xlu0 %1106 }
 0x3f3   :  { %v1188_v24 = vadd.f32 %v1107_v16, %v2392_v21 }
 0x3f6   :  { %v1117_v14 = vpop.permute.xlu0 %1116 }
 0x3f7   :  { %v2281_v38 = vadd.f32 %v1117_v14, %v2393_v29 }
 0x3fa   :  { %v1127_v17 = vpop.permute.xlu0 %1126 }
 0x3fb   :  { %v2284_v54 = vadd.f32 %v1127_v17, %v2394_v37 }
 0x3fe   :  { %v1137_v60 = vpop.permute.xlu0 %1136 }
 0x3ff   :  { %v2287_v27 = vadd.f32 %v1137_v60, %v2395_v26 }
 0x402   :  { %v1147_v50 = vpop.permute.xlu0 %1146 }
 0x403   :  { %v2290_v28 = vadd.f32 %v1147_v50, %v2396_v48 }
 0x406   :  { %v1157_v41 = vpop.permute.xlu0 %1156 }
 0x407   :  { %v2293_v30 = vadd.f32 %v1157_v41, %v2397_v55 }
 0x40a   :  { %v1167_v56 = vpop.permute.xlu0 %1166 }
 0x40b   :  { %v2296_v33 = vadd.f32 %v1167_v56, %v2398_v59 }
 0x420   :  { %s1686_s6 = spop %1685 }
 0x421   :  { %s1293_s28 = smul.f32 0.0009765625, %s1686_s6 }
 0x423   :  { %v2298_v35 = vstv %s1293_s28 }
 0x424   :  { %v1327_v40 = vsub.f32 %v1169_v58, %v2298_v35  ;;  %v1328_v42 = vsub.f32 %v1170_v1, %v2298_v35  ;;  %v1329_v43 = vsub.f32 %v1171_v53, %v2298_v35  ;;  %v1330_v60 = vsub.f32 %v1172_v62, %v2298_v35 }
 0x425   :  { %v1331_v46 = vsub.f32 %v1173_v36, %v2298_v35  ;;  %v1332_v49 = vsub.f32 %v1174_v20, %v2298_v35  ;;  %v1333_v41 = vsub.f32 %v1175_v2, %v2298_v35  ;;  %v1334_v61 = vsub.f32 %v1176_v25, %v2298_v35 }
 0x426   :  { %v1335_v4 = vsub.f32 %v1177_v3, %v2298_v35  ;;  %v1336_v5 = vsub.f32 %v1178_v23, %v2298_v35  ;;  %v1337_v8 = vsub.f32 %v1179_v6, %v2298_v35  ;;  %v1338_v10 = vsub.f32 %v1180_v19, %v2298_v35  ;;  %1359 = vst [vmem:[#allocation11] sm:$0xff] %v1327_v40 }
 0x427   :  { %1360 = vst [vmem:[#allocation11 + $0x8] sm:$0xff] %v1328_v42  ;;  %1361 = vst [vmem:[#allocation11 + $0x10] sm:$0xff] %v1329_v43  ;;  %v1339_v36 = vsub.f32 %v1181_v0, %v2298_v35  ;;  %v1340_v20 = vsub.f32 %v2243_v9, %v2298_v35  ;;  %v1341_v25 = vsub.f32 %v2250_v32, %v2298_v35 }
 0x428   :  { %1362 = vst [vmem:[#allocation11 + $0x18] sm:$0xff] %v1330_v60  ;;  %v1342_v11 = vsub.f32 %v1184_v63, %v2298_v35  ;;  %1363 = vst [vmem:[#allocation11 + $0x20] sm:$0xff] %v1331_v46  ;;  %v1343_v6 = vsub.f32 %v2254_v34, %v2298_v35  ;;  %v1344_v16 = vsub.f32 %v1186_v13, %v2298_v35 }
 0x429   :  { %1364 = vst [vmem:[#allocation11 + $0x28] sm:$0xff] %v1332_v49  ;;  %1365 = vst [vmem:[#allocation11 + $0x30] sm:$0xff] %v1333_v41  ;;  %v1345_v12 = vsub.f32 %v2257_v31, %v2298_v35  ;;  %v1346_v9 = vsub.f32 %v1188_v24, %v2298_v35  ;;  %v1347_v14 = vsub.f32 %v2260_v45, %v2298_v35 }
 0x42a   :  { %1366 = vst [vmem:[#allocation11 + $0x38] sm:$0xff] %v1334_v61  ;;  %1367 = vst [vmem:[#allocation11 + $0x40] sm:$0xff] %v1335_v4  ;;  %v1348_v15 = vsub.f32 %v2281_v38, %v2298_v35  ;;  %v1349_v17 = vsub.f32 %v2263_v39, %v2298_v35  ;;  %v1350_v18 = vsub.f32 %v2284_v54, %v2298_v35 }
 0x42b   :  { %1368 = vst [vmem:[#allocation11 + $0x48] sm:$0xff] %v1336_v5  ;;  %1369 = vst [vmem:[#allocation11 + $0x50] sm:$0xff] %v1337_v8  ;;  %v1351_v50 = vsub.f32 %v2266_v44, %v2298_v35  ;;  %v1352_v52 = vsub.f32 %v2287_v27, %v2298_v35  ;;  %v1353_v53 = vsub.f32 %v2269_v47, %v2298_v35 }
 0x42c   :  { %1370 = vst [vmem:[#allocation11 + $0x58] sm:$0xff] %v1338_v10  ;;  %1371 = vst [vmem:[#allocation11 + $0x60] sm:$0xff] %v1339_v36  ;;  %v1354_v58 = vsub.f32 %v2290_v28, %v2298_v35  ;;  %v1355_v62 = vsub.f32 %v2272_v51, %v2298_v35  ;;  %v1356_v1 = vsub.f32 %v2293_v30, %v2298_v35 }
 0x42d   :  { %1372 = vst [vmem:[#allocation11 + $0x68] sm:$0xff] %v1340_v20  ;;  %1373 = vst [vmem:[#allocation11 + $0x70] sm:$0xff] %v1341_v25  ;;  %v1357_v2 = vsub.f32 %v2275_v57, %v2298_v35  ;;  %v1358_v3 = vsub.f32 %v2296_v33, %v2298_v35 }
 0x42e   :  { %1374 = vst [vmem:[#allocation11 + $0x78] sm:$0xff] %v1342_v11  ;;  %1375 = vst [vmem:[#allocation11 + $0x80] sm:$0xff] %v1343_v6 }
 0x42f   :  { %1376 = vst [vmem:[#allocation11 + $0x88] sm:$0xff] %v1344_v16  ;;  %1377 = vst [vmem:[#allocation11 + $0x90] sm:$0xff] %v1345_v12 }
 0x430   :  { %1378 = vst [vmem:[#allocation11 + $0x98] sm:$0xff] %v1346_v9  ;;  %1379 = vst [vmem:[#allocation11 + $0xa0] sm:$0xff] %v1347_v14 }
 0x431   :  { %1380 = vst [vmem:[#allocation11 + $0xa8] sm:$0xff] %v1348_v15  ;;  %1381 = vst [vmem:[#allocation11 + $0xb0] sm:$0xff] %v1349_v17 }
 0x432   :  { %1382 = vst [vmem:[#allocation11 + $0xb8] sm:$0xff] %v1350_v18  ;;  %1383 = vst [vmem:[#allocation11 + $0xc0] sm:$0xff] %v1351_v50 }
 0x433   :  { %1384 = vst [vmem:[#allocation11 + $0xc8] sm:$0xff] %v1352_v52  ;;  %1385 = vst [vmem:[#allocation11 + $0xd0] sm:$0xff] %v1353_v53 }
 0x434   :  { %1386 = vst [vmem:[#allocation11 + $0xd8] sm:$0xff] %v1354_v58  ;;  %1387 = vst [vmem:[#allocation11 + $0xe0] sm:$0xff] %v1355_v62 }
 0x435   :  { %1388 = vst [vmem:[#allocation11 + $0xe8] sm:$0xff] %v1356_v1  ;;  %1389 = vst [vmem:[#allocation11 + $0xf0] sm:$0xff] %v1357_v2 }
 0x436   :  { %1390 = vst [vmem:[#allocation11 + $0xf8] sm:$0xff] %v1358_v3 }
 0x437   :  { %1839 = shalt.err (!%p1836_p8)
}
 0x438   :  { %s1840_s11 = scalar_lea.hbm %s2374_s7, 4096 }
 0x439   :  { %p1841_p9 = scmp.ne.s32.totalorder %s2374_s7, %s1840_s11  ;;  %p1844_p10 = scmp.lt.u32.totalorder %s1840_s11, %s2374_s7 }
 0x43b   :  { %p1846_p11 = pnand %p1844_p10, %p1841_p9 }
 0x43d   :  { %1849 = shalt.err (!%p1846_p11)
}
 0x43e   :  { %s1867_s27 = smov 128   ;;  %s1868_s17 = smov 8  }
 0x43f   :  { %1402 = dma.vmem_to_hbm [thread:$0]  %s2340_s30, 4096, %s2374_s7, [#allocation5], %s1867_s27, %s1867_s27, %s1868_s17  }
 0x440   :  { %1856 = dma.done.wait [#allocation5], 4096  }
 0x441   :  { %1857 = vsyncadd [#allocation5], 4294963200 }
 0x442   :  { %1406 = vsyncpa [#allocation4], 1 }
 0x443   :  { %1407 = vsyncpa [#allocation7], 1 }
 0x444   :  { %1408 = vsyncpa [#allocation10], 1 }
 0x445   :  { %1409 = vsyncpa [#allocation5], 1 }

</bundles_post_ra>
